<compile_context>
chip_gen: v7x
topology: tpu7x:2x2x1
jax: 0.10.0
libtpu: 0.0.40
codegen_flags: <defaults>
</compile_context>

<pallas_src>
import functools

import jax
import jax.numpy as jnp
import numpy as np
from jax.experimental import pallas as pl
from jax.experimental.pallas import tpu as pltpu


def _se_kernel(x_ref, w1_ref, w2t_ref, o_ref, *, inv_s):
    """x_ref/o_ref: (Bt, C, Sp); w1_ref: (Cr, C) = W1; w2t_ref: (Cr, C) = W2^T."""
    # ---- Squeeze: mean over the spatial (lane) axis. ----
    # Zero padding of S (if any) does not perturb the sum; divide by the true
    # S via the baked-in compile-time constant.  Only the (Bt, C) result stays
    # live after this pass.
    pooled = jnp.sum(x_ref[...], axis=-1).astype(jnp.float32) * inv_s      # (Bt, C)

    # ---- Excitation ----
    # FC1 (C -> Cr): Cr = C // 16 is tiny, so a VPU broadcast-multiply + lane
    # reduce beats pushing a 128-lane-padded, 4-lane-useful matmul through the
    # MXU (pure fixed latency per grid step, esp. on v5e).
    h = jnp.sum(pooled[:, None, :] * w1_ref[...][None, :, :].astype(jnp.float32),
                axis=-1)                                                    # (Bt, Cr)
    h = jnp.maximum(h, 0.0)
    # FC2 (Cr -> C): small MXU matmul with M = Bt.
    y = jnp.dot(h, w2t_ref[...].astype(jnp.float32),
                preferred_element_type=jnp.float32)                         # (Bt, C)
    gate = jax.nn.sigmoid(y).astype(o_ref.dtype)[:, :, None]                # (Bt, C, 1)

    # ---- Scale: stream x from VMEM again (no long live range across the
    # excitation) and fuse the gate multiply directly into the store.
    o_ref[...] = x_ref[...] * gate


def _vmem_block_budget_bytes():
    """Bytes allowed for the double-buffered in/out blocks."""
    try:
        cap = int(pltpu.get_tpu_info().vmem_capacity_bytes)
    except Exception:
        cap = 64 << 20   # conservative: v7x has 64 MiB per TensorCore
    return int(cap * 0.55)


def _pick_batch_tile(B, C, Sp, itemsize, budget_bytes):
    """Largest divisor of B whose double-buffered in+out blocks fit the budget."""
    bt = 1
    for d in range(1, B + 1):
        if B % d == 0 and 4 * d * C * Sp * itemsize <= budget_bytes:
            bt = d
    # Keep >= 2 grid steps when B >= 2 so a 2-TensorCore chip (v7x) can split
    # the 'parallel' batch axis across cores.
    if B >= 2 and B // bt < 2:
        bt = max(d for d in range(1, bt) if B % d == 0)
    return bt


def se_layer(x, w1, w2):
    """x: (B, C, D, H, W); w1: (C//r, C); w2: (C, C//r). Returns x's shape/dtype."""
    B, C, D, H, W = x.shape
    S = D * H * W
    Cr = w1.shape[0]
    itemsize = x.dtype.itemsize

    # Lane-dense layout: spatial axis last, padded to a multiple of 128.
    Sp = ((S + 127) // 128) * 128
    x3 = x.reshape(B, C, S)
    if Sp != S:
        x3 = jnp.pad(x3, ((0, 0), (0, 0), (0, Sp - S)))

    budget = _vmem_block_budget_bytes()
    Bt = _pick_batch_tile(B, C, Sp, itemsize, budget)
    # TODO(synk): if even a (1, C, Sp) block exceeds the VMEM budget, also tile
    # S with an accumulator pass for the pooled mean.

    block_bytes = Bt * C * Sp * itemsize
    w_bytes = (w1.size + w2.size) * w1.dtype.itemsize
    vmem_need = 4 * block_bytes + 2 * w_bytes + (4 << 20)   # dbl-buffered in + out
    vmem_limit = min(64 << 20, max(32 << 20, vmem_need))

    cost = pl.CostEstimate(
        flops=int(2 * B * C * S + 4 * B * Cr * C),
        transcendentals=int(B * C),
        bytes_accessed=int(2 * B * C * Sp * itemsize + 2 * w_bytes),
    )

    kernel = functools.partial(_se_kernel, inv_s=1.0 / float(S))

    out3 = pl.pallas_call(
        kernel,
        out_shape=jax.ShapeDtypeStruct((B, C, Sp), x.dtype),
        grid_spec=pltpu.PrefetchScalarGridSpec(
            num_scalar_prefetch=0,
            grid=(B // Bt,),
            in_specs=[
                pl.BlockSpec((Bt, C, Sp), lambda i: (i, 0, 0)),
                pl.BlockSpec((Cr, C), lambda i: (0, 0)),   # W1 (native layout)
                pl.BlockSpec((Cr, C), lambda i: (0, 0)),   # W2^T
            ],
            out_specs=pl.BlockSpec((Bt, C, Sp), lambda i: (i, 0, 0)),
        ),
        compiler_params=pltpu.CompilerParams(
            dimension_semantics=("parallel",),
            vmem_limit_bytes=int(vmem_limit),
        ),
        cost_estimate=cost,
        # NOTE: input_output_aliases={0: 0} would save one HBM allocation, but
        # only pays off when the caller donates x; left off so the undonated
        # test input stays valid (XLA would otherwise insert a copy anyway).
    )(x3, w1, w2.T)

    if Sp != S:
        out3 = out3[:, :, :S]
    return out3.reshape(B, C, D, H, W)


def se_layer_ref(x, w1, w2):
    pooled = jnp.mean(x, axis=(2, 3, 4))                 # (B, C)
    h = jnp.maximum(pooled @ w1.T, 0.0)                  # (B, C//r)
    y = jax.nn.sigmoid(h @ w2.T)                         # (B, C)
    return x * y[:, :, None, None, None]


if __name__ == "__main__":
    key = jax.random.PRNGKey(0)
    k_x, k_w1, k_w2 = jax.random.split(key, 3)

    # Small shapes consistent with SELayer(channel=64, reduction=16).
    B, C, D, H, W = 2, 64, 4, 8, 8
    reduction = 16
    Cr = C // reduction

    x = jax.random.normal(k_x, (B, C, D, H, W), dtype=jnp.float32)
    # Deterministic synthetic weights (no bias, per the module definition).
    w1 = jax.random.normal(k_w1, (Cr, C), dtype=jnp.float32) * (1.0 / np.sqrt(C))
    w2 = jax.random.normal(k_w2, (C, Cr), dtype=jnp.float32) * (1.0 / np.sqrt(Cr))

    out = se_layer(x, w1, w2)
    out = jax.block_until_ready(out)

    ref = se_layer_ref(x, w1, w2)
    assert out.shape == (B, C, D, H, W)
    np.testing.assert_allclose(np.asarray(out), np.asarray(ref), rtol=1e-5, atol=1e-5)

    print("KERNEL_OK")
</pallas_src>

<mosaic_0001>
module attributes {stable_mosaic.version = 11 : i64} {
  func.func @_se_kernel(%arg0: i32, %arg1: memref<1x64x256xf32, #tpu.memory_space<vmem>>, %arg2: memref<4x64xf32, #tpu.memory_space<vmem>>, %arg3: memref<4x64xf32, #tpu.memory_space<vmem>>, %arg4: memref<1x64x256xf32, #tpu.memory_space<vmem>>) attributes {dimension_semantics = [#tpu.dimension_semantics<parallel>], iteration_bounds = array<i64: 2>, scalar_prefetch = 0 : i64, scratch_operands = 0 : i64, tpu.core_type = #tpu.core_type<tc>, window_params = [{transform_indices = @transform_0, window_bounds = array<i64: 1, 64, 256>}, {pipeline_mode = #tpu.pipeline_mode<synchronous>, transform_indices = @transform_1, window_bounds = array<i64: 4, 64>}, {pipeline_mode = #tpu.pipeline_mode<synchronous>, transform_indices = @transform_2, window_bounds = array<i64: 4, 64>}, {transform_indices = @transform_3, window_bounds = array<i64: 1, 64, 256>}]} {
    %c0 = arith.constant 0 : index
    %c0_0 = arith.constant 0 : index
    %c0_1 = arith.constant 0 : index
    %0 = vector.load %arg1[%c0, %c0_0, %c0_1] : memref<1x64x256xf32, #tpu.memory_space<vmem>>, vector<1x64x256xf32>
    %cst = arith.constant dense<0.000000e+00> : vector<1x64xf32>
    %1 = vector.multi_reduction <add>, %0, %cst [2] : vector<1x64x256xf32> to vector<1x64xf32>
    %cst_2 = arith.constant 3.906250e-03 : f32
    %2 = vector.broadcast %cst_2 : f32 to vector<1x64xf32>
    %3 = arith.mulf %1, %2 : vector<1x64xf32>
    %4 = vector.shape_cast %3 : vector<1x64xf32> to vector<1x1x64xf32>
    %c0_3 = arith.constant 0 : index
    %c0_4 = arith.constant 0 : index
    %5 = vector.load %arg2[%c0_3, %c0_4] : memref<4x64xf32, #tpu.memory_space<vmem>>, vector<4x64xf32>
    %6 = vector.shape_cast %5 : vector<4x64xf32> to vector<1x4x64xf32>
    %7 = vector.broadcast %4 : vector<1x1x64xf32> to vector<1x4x64xf32>
    %8 = arith.mulf %7, %6 : vector<1x4x64xf32>
    %cst_5 = arith.constant dense<0.000000e+00> : vector<1x4xf32>
    %9 = vector.multi_reduction <add>, %8, %cst_5 [2] : vector<1x4x64xf32> to vector<1x4xf32>
    %cst_6 = arith.constant 0.000000e+00 : f32
    %10 = vector.broadcast %cst_6 : f32 to vector<1x4xf32>
    %11 = arith.maximumf %9, %10 : vector<1x4xf32>
    %c0_7 = arith.constant 0 : index
    %c0_8 = arith.constant 0 : index
    %12 = vector.load %arg3[%c0_7, %c0_8] : memref<4x64xf32, #tpu.memory_space<vmem>>, vector<4x64xf32>
    %cst_9 = arith.constant dense<0.000000e+00> : vector<1x64xf32>
    %13 = tpu.matmul %11, %12, %cst_9 {dimension_numbers = #tpu.dot_dimension_numbers<[1], [0], [0], [1], [0, 0, 1, 1], [], []>} : vector<1x4xf32>, vector<4x64xf32>, vector<1x64xf32> -> vector<1x64xf32>
    %14 = arith.negf %13 : vector<1x64xf32>
    %15 = math.exp %14 : vector<1x64xf32>
    %cst_10 = arith.constant 1.000000e+00 : f32
    %16 = vector.broadcast %cst_10 : f32 to vector<1x64xf32>
    %17 = arith.addf %16, %15 : vector<1x64xf32>
    %18 = arith.divf %16, %17 : vector<1x64xf32>
    %19 = vector.shape_cast %18 : vector<1x64xf32> to vector<1x64x1xf32>
    %c0_11 = arith.constant 0 : index
    %c0_12 = arith.constant 0 : index
    %c0_13 = arith.constant 0 : index
    %20 = vector.load %arg1[%c0_11, %c0_12, %c0_13] : memref<1x64x256xf32, #tpu.memory_space<vmem>>, vector<1x64x256xf32>
    %21 = vector.broadcast %19 : vector<1x64x1xf32> to vector<1x64x256xf32>
    %22 = arith.mulf %20, %21 : vector<1x64x256xf32>
    %c0_14 = arith.constant 0 : index
    %c0_15 = arith.constant 0 : index
    %c0_16 = arith.constant 0 : index
    %23 = vector.load %arg4[%c0_14, %c0_15, %c0_16] : memref<1x64x256xf32, #tpu.memory_space<vmem>>, vector<1x64x256xf32>
    tpu.vector_store %arg4[%c0_14, %c0_15, %c0_16], %22 {strides = array<i32>} : memref<1x64x256xf32, #tpu.memory_space<vmem>>, vector<1x64x256xf32>,
    return
  }
  func.func @transform_0(%arg0: i32) -> (i32, i32, i32) {
    %c0_i32 = arith.constant 0 : i32
    %c0_i32_0 = arith.constant 0 : i32
    %c0_i32_1 = arith.constant 0 : i32
    return %arg0, %c0_i32, %c0_i32_0 : i32, i32, i32
  }
  func.func @transform_1(%arg0: i32) -> (i32, i32) {
    %c0_i32 = arith.constant 0 : i32
    %c0_i32_0 = arith.constant 0 : i32
    %c0_i32_1 = arith.constant 0 : i32
    return %c0_i32, %c0_i32_0 : i32, i32
  }
  func.func @transform_2(%arg0: i32) -> (i32, i32) {
    %c0_i32 = arith.constant 0 : i32
    %c0_i32_0 = arith.constant 0 : i32
    %c0_i32_1 = arith.constant 0 : i32
    return %c0_i32, %c0_i32_0 : i32, i32
  }
  func.func @transform_3(%arg0: i32) -> (i32, i32, i32) {
    %c0_i32 = arith.constant 0 : i32
    %c0_i32_0 = arith.constant 0 : i32
    %c0_i32_1 = arith.constant 0 : i32
    return %arg0, %c0_i32, %c0_i32_0 : i32, i32, i32
  }
}

</mosaic_0001>

<bundles_post_ra>
// kernel: tpu_custom_call.1
= control target key start
LH: loop header
LB: loop body
LE: loop exit
PB: predicated region body
PF: predicated region fallthrough
CT: control target
= control target key end

     0   :  { %8 = vsyncpa [#allocation3], 0  ;;  %s1734_s0 = inlined_call_operand.hbm [shape: f32[2,64,256], index: 0, kind: input, shape index: {}]   ;;  %s1735_s1 = inlined_call_operand.hbm [shape: f32[4,64], index: 1, kind: input, shape index: {}]   ;;  %s1736_s2 = inlined_call_operand.vmem [shape: f32[4,64], index: 2, kind: input, shape index: {}]   ;;  %s1737_s3 = inlined_call_operand.hbm [shape: f32[2,64,256], index: 3, kind: output, shape index: {}]  }
   0x1   :  { %10 = vsyncpa [#allocation3 + $0x1], 0 }
   0x2   :  { %11 = vsyncpa [#allocation6], 0 }
   0x3   :  { %12 = vsyncpa [#allocation4], 0 }
   0x4   :  { %14 = vsyncpa [#allocation4 + $0x1], 0  ;;  %s1279_s12 = smov 0   ;;  %s1281_s13 = smov 0  }
   0x5   :  { %s1283_s14 = smov 0   ;;  %s1285_s15 = smov 0  }
   0x6 LB: > { %s1300_s16 = sadd.s32 4294967295, %s1247_s15   ;;  %s1021_s17 = sadd.s32 4294967294, %s1247_s15   ;;  %s1247_s15 = sphi %s1285_s15, %s1762_s15   ;;  %s1243_s14 = sphi %s1283_s14, %s1761_s14   ;;  %s1239_s13 = sphi %s1281_s13, %s1760_s13   ;;  %s1235_s12 = sphi %s1279_s12, %s1759_s12  }
   0x7   : > { %s1304_s18 = sadd.s32 1, %s1247_s15   ;;  %s27_s19 = sadd.s32 1, %s1243_s14 }
   0x8   : > { %s24_s20 = ssub.s32 %s1247_s15, %s1304_s18  ;;  %p34_p0 = scmp.ne.s32.totalorder %s1243_s14, %s1239_s13 }
   0x9   : > { %p25_p1 = scmp.eq.s32.totalorder %s24_s20, 0  ;;  %p35_p2 = scmp.eq.s32.totalorder %s1247_s15, 0 }
   0xa   : > { %p40_p3 = scmp.ne.s32.totalorder %s1239_s13, %s1235_s12  ;;  %p1738_p4 = scmp.eq.s32.totalorder %s1300_s16, 0 }
   0xb   : > { %s1316_s21 = scalar_select %p25_p1, %s1243_s14, %s27_s19  }
   0xc   : > { %p1318_p5 = por %p35_p2, %p34_p0  ;;  %p1324_p6 = por %p1738_p4, %p40_p3 }
   0xd   : > { %p106_p7 = scmp.eq.s32.totalorder %s1300_s16, 1  ;;  %p112_p8 = scmp.eq.s32.totalorder %s1021_s17, 1 }
   0xe   : > { %s1744_s23 = scalar_select %p1324_p6, 1, 0 }
   0xf   : > { %p1022_p9 = scmp.ge.s32.totalorder %s1247_s15, 1  ;;  %p119_p10 = scmp.lt.s32.totalorder %s1247_s15, 3 }
  0x10   : > { %p1331_p11 = por %p106_p7, %p34_p0  ;;  %p1335_p12 = por %p112_p8, %p40_p3 }
  0x11   : > { %p1339_p13 = pnand %p1022_p9, %p119_p10  ;;  %s1249_s27 = smov [#allocation5]  }
  0x12   : > { %s1745_s24 = scalar_select %p1331_p11, 1, 0 }
  0x13   : > { %s1746_s25 = scalar_select %p1335_p12, 1, 0 }
  0x14   : > { %s1747_s26 = scalar_select %p1339_p13, 1, 0 }
  0x15   : > { %p1057_p2 = pneg %p1339_p13  ;;  %s132_s28 = sshll.u32 %s1249_s27, 4  ;;  %s133_s28 = int_to_ptr.vmem [resolvable:$true] %s132_s28 }
  0x16   : > { %p1070_p4 = scmp.lt.s32.totalorder %s1247_s15, 2  ;;  %p1748_p0 = scmp.eq.s32.totalorder %s1300_s16, 0 }
  0x17   : > { %s146_s30 = sand.u32 1, %s1243_s14   ;;  %s1119_s8 = scalar_lea.hbm %s1735_s1, 64 }
  0x18   : > { %p1349_p7 = pnand %p1057_p2, %p1748_p0  ;;  %p1356_p3 = pnand %p1070_p4, %p1318_p5 }
  0x19   : > { %s1025_s5 = sshll.u32 %s146_s30, 7  ;;  %p1120_p8 = scmp.ne.s32.totalorder %s1735_s1, %s1119_s8 }
  0x1a   : > { %s1750_s4 = scalar_select %p1356_p3, 1, 0 }
  0x1b   : > { %p1121_p9 = pneg %p1349_p7  ;;  %p1126_p4 = scmp.lt.u32.totalorder %s1119_s8, %s1735_s1 }
  0x1d   : > { %p1122_p10 = pnand %p1121_p9, %p1120_p8 }
  0x1f   : > { %p1123_p2 = pneg %p1122_p10 }
  0x21   : > { %p1128_p5 = pnand %p1126_p4, %p1123_p2 }
  0x23   : > { %1131 = shalt.err (!%p1128_p5)
}
  0x24   : > { %s1132_s19 = scalar_lea.vmem %s133_s28, 64  ;;  %p1140_p11 = scmp.lt.s32.totalorder %s133_s28, %s133_s28 }
  0x25   : > { %p1133_p0 = scmp.ne.s32.totalorder %s133_s28, %s1132_s19  ;;  %p1141_p6 = scmp.lt.s32.totalorder %s1132_s19, %s1132_s19 }
  0x27   : > { %p1135_p1 = pnand %p1133_p0, %p1121_p9  ;;  %p1142_p13 = por %p1141_p6, %p1140_p11 }
  0x29   : > { %p1136_p12 = pneg %p1135_p1 }
  0x2b   : > { %p1143_p3 = pnand %p1142_p13, %p1136_p12 }
  0x2d   : > { %1146 = shalt.err (!%p1143_p3)
}
  0x2e   : > { %1060 = dma.hbm_to_vmem [thread:$0]  (!%p1349_p7), %s1735_s1, 64, %s133_s28, [#allocation6]  }
  0x2f   : > { %s1040_s27 = sshll.u32 %s1247_s15, 11  ;;  %s150_s6 = scalar_lea.vmem [#allocation2], %s1025_s5 }
  0x30   : > { %s157_s7 = sshll.u32 %s150_s6, 4  ;;  %s1380_s10 = scalar_lea.hbm %s1734_s0, %s1040_s27  ;;  %s1382_s7 = int_to_ptr.vmem [resolvable:$true] %s157_s7 }
  0x31   : > { %s1384_s29 = scalar_lea.sflag [#allocation3], %s146_s30  ;;  %s1147_s11 = scalar_lea.hbm %s1380_s10, 2048 }
  0x32   : > { %p1148_p6 = scmp.ne.s32.totalorder %s1380_s10, %s1147_s11  ;;  %p1751_p11 = scmp.ne.s32.totalorder %s1750_s4, 0 }
  0x33   : > { %s1152_s17 = scalar_lea.hbm %s1734_s0, 4096  ;;  %p1153_p7 = scmp.lt.u32.totalorder %s1380_s10, %s1734_s0 }
  0x34   : > { %p1149_p12 = pneg %p1751_p11  ;;  %p1154_p3 = scmp.lt.u32.totalorder %s1152_s17, %s1147_s11 }
  0x35   : > { %p1156_p9 = scmp.lt.u32.totalorder %s1147_s11, %s1380_s10 }
  0x36   : > { %p1150_p13 = pnand %p1149_p12, %p1148_p6  ;;  %p1155_p8 = por %p1154_p3, %p1153_p7 }
  0x38   : > { %p1151_p1 = pneg %p1150_p13  ;;  %p1157_p10 = por %p1156_p9, %p1155_p8 }
  0x3a   : > { %p1158_p2 = pnand %p1157_p10, %p1151_p1 }
  0x3c   : > { %1161 = shalt.err (!%p1158_p2)
}
  0x3d   : > { %s1162_s30 = scalar_lea.vmem %s1382_s7, 2048  ;;  %s1250_s22 = smov [#allocation2]  }
  0x3e   : > { %p1163_p4 = scmp.ne.s32.totalorder %s1382_s7, %s1162_s30  ;;  %s1167_s27 = sshll.u32 %s1250_s22, 4  ;;  %s1168_s27 = int_to_ptr.vmem [resolvable:$false] %s1167_s27 }
  0x3f   : > { %s1169_s6 = scalar_lea.vmem %s1168_s27, 4096  ;;  %p1170_p6 = scmp.lt.s32.totalorder %s1382_s7, %s1168_s27 }
  0x40   : > { %p1165_p5 = pnand %p1163_p4, %p1149_p12  ;;  %p1171_p13 = scmp.lt.s32.totalorder %s1169_s6, %s1162_s30 }
  0x42   : > { %p1166_p0 = pneg %p1165_p5  ;;  %p1172_p7 = por %p1171_p13, %p1170_p6 }
  0x44   : > { %p1173_p3 = pnand %p1172_p7, %p1166_p0 }
  0x46   : > { %1176 = shalt.err (!%p1173_p3)
}
  0x47   : > { %s1251_s8 = smov 256   ;;  %s1252_s9 = smov 16  }
  0x48   : > { %1064 = dma.hbm_to_vmem [thread:$0]  (!%p1751_p11), %s1380_s10, 2048, %s1382_s7, %s1384_s29, %s1251_s8, %s1251_s8, %s1252_s9  }
  0x49   : > { %p1752_p12 = scmp.ne.s32.totalorder %s1747_s26, 0 }
  0x4a   : > { %s1415_s11 = sand.u32 (!%p1752_p12), 1, %s1239_s13   ;;  %p1753_p1 = scmp.ne.s32.totalorder (!%p1752_p12), %s1744_s23, 0 }
  0x4b   : > { %169 = sbr.rel (%p1752_p12) target bundleno = 992 (0x3e0), region = 32  ;;  %s1029_s28 = sshll.u32 (!%p1752_p12), %s1415_s11, 7 }
  0x4c   : > { %s172_s5 = scalar_lea.sflag (!%p1752_p12), [#allocation3], %s1415_s11  ;;  %s175_s17 = scalar_lea.vmem (!%p1752_p12), [#allocation2], %s1029_s28 }
  0x52   : > { %1222 = dma.done.wait (%p1753_p1), %s172_s5, 2048  }
  0x53   : > { %1224 = vsyncadd (%p1753_p1), %s172_s5, 4294965248  ;;  %p1754_p11 = scmp.eq.s32.totalorder %s1300_s16, 0 }
  0x55   : > { %1226 = dma.done.wait (%p1754_p11), [#allocation6], 64   ;;  %p1755_p8 = pmov %p1754_p11 }
  0x56   : > { %v1429_v0 = vld [vmem:[%s175_s17 + $0x20] sm:$0xff]  ;;  %v1431_v1 = vld [vmem:[%s175_s17 + $0x28] sm:$0xff]  ;;  %v1439_v5 = vld [vmem:[%s175_s17 + $0x30] sm:$0xff]  ;;  %v252_v24 = vlaneseq  ;;  %v1253_v31 = vmov 0   ;;  %vm595_vm0 = vcmask 130112   ;;  %vm602_vm1 = vcmask 195712  }
  0x57   : > { %1228 = vsyncadd (%p1755_p8), [#allocation6], 4294967232  ;;  %v1433_v2 = vld [vmem:[%s175_s17] sm:$0xff]  ;;  %v224_v3 = vadd.f32 %v1431_v1, %v1429_v0  ;;  %v1437_v4 = vld [vmem:[%s175_s17 + $0x8] sm:$0xff]  ;;  %1114 = vset.pattern.permute.xlu1 %v1253_v31  ;;  %1113 = vset.pattern.permute.xlu0 %v1253_v31  ;;  %vm609_vm2 = vcmask 261312   ;;  %vm616_vm3 = vcmask 326912  }
  0x58   : > { %v1441_v6 = vld [vmem:[%s175_s17 + $0x38] sm:$0xff]  ;;  %v218_v7 = vadd.f32 %v1437_v4, %v1433_v2  ;;  %v1445_v8 = vld [vmem:[%s175_s17 + $0x10] sm:$0xff]  ;;  %v1457_v14 = vld [vmem:[%s175_s17 + $0x40] sm:$0xff]  ;;  %v1478_v25 = vshrl.u32 %v252_v24, 7  ;;  %vm623_vm4 = vcmask 392512   ;;  %vm630_vm5 = vcmask 458112  }
  0x59   : > { %v1447_v9 = vld [vmem:[%s175_s17 + $0x18] sm:$0xff]  ;;  %225 = vadd.xlane.f32.xlu1 %v224_v3  ;;  %v227_v10 = vadd.f32 %v1441_v6, %v1439_v5  ;;  %v1453_v12 = vld [vmem:[%s175_s17 + $0x50] sm:$0xff]  ;;  %v1459_v15 = vld [vmem:[%s175_s17 + $0x48] sm:$0xff]  ;;  %vm637_vm6 = vcmask 523712   ;;  %vm756_vm7 = vcmask 1041409   ;;  %vm758_vm8 = vcmask 1042434  }
  0x5a   : > { %219 = vadd.xlane.f32.xlu0 %v218_v7  ;;  %v221_v11 = vadd.f32 %v1447_v9, %v1445_v8  ;;  %v1455_v13 = vld [vmem:[%s175_s17 + $0x58] sm:$0xff]  ;;  %v230_v17 = vadd.f32 %v1459_v15, %v1457_v14  ;;  %v1465_v18 = vld [vmem:[%s175_s17 + $0x70] sm:$0xff]  ;;  %v1469_v20 = vld [vmem:[%s175_s17 + $0x60] sm:$0xff]  ;;  %v254_v26 = vsub.s32 0, %v1478_v25  ;;  %v289_v29 = vsub.s32 1, %v1478_v25  ;;  %s1651_s4 = scalar_lea.vmem [#allocation7], %s1029_s28 }
  0x5b   : > { %v233_v16 = vadd.f32 %v1455_v13, %v1453_v12  ;;  %v1467_v19 = vld [vmem:[%s175_s17 + $0x78] sm:$0xff]  ;;  %v1471_v21 = vld [vmem:[%s175_s17 + $0x68] sm:$0xff]  ;;  %v250_v27 = vld [vmem:[#allocation5] sm:$0xf]  ;;  %v324_v32 = vsub.s32 2, %v1478_v25  ;;  %v359_v34 = vsub.s32 3, %v1478_v25 }
  0x5c   : > { %v239_v22 = vadd.f32 %v1467_v19, %v1465_v18  ;;  %v236_v23 = vadd.f32 %v1471_v21, %v1469_v20  ;;  %v255_v28 = vrot.slane %v250_v27, %v254_v26  ;;  %v290_v30 = vrot.slane %v250_v27, %v289_v29  ;;  %s1041_s7 = sshll.u32 %s1300_s16, 11  ;;  %s938_s10 = sshll.u32 %s1651_s4, 4  ;;  %s1686_s10 = int_to_ptr.vmem [resolvable:$true] %s938_s10 }
  0x5d   : > { %228 = vadd.xlane.f32.xlu1 %v227_v10  ;;  %v325_v33 = vrot.slane %v250_v27, %v324_v32  ;;  %v360_v35 = vrot.slane %v250_v27, %v359_v34  ;;  %vm760_vm9 = vcmask 1043459   ;;  %vm763_vm10 = vcmask 519168   ;;  %s1684_s20 = scalar_lea.hbm %s1737_s3, %s1041_s7  ;;  %s925_s16 = scalar_lea.sflag [#allocation4], %s1415_s11 }
  0x5e   : > { %222 = vadd.xlane.f32.xlu0 %v221_v11  ;;  %vm777_vm11 = vcmask 1043456   ;;  %vm1255_vm12 = vmmov 0   ;;  %vm774_vm13 = vcmask 31744   ;;  %s1177_s30 = scalar_lea.vmem %s1686_s10, 2048  ;;  %p1756_p10 = scmp.ne.s32.totalorder %s1745_s24, 0 }
  0x5f   : > { %p1178_p9 = scmp.ne.s32.totalorder %s1686_s10, %s1177_s30  ;;  %s1256_s22 = smov [#allocation7]  }
  0x60   : > { %s1181_s27 = sshll.u32 %s1256_s22, 4  ;;  %s1182_s27 = int_to_ptr.vmem [resolvable:$false] %s1181_s27 }
  0x61   : > { %234 = vadd.xlane.f32.xlu1 %v233_v16  ;;  %p1179_p2 = pnand %p1178_p9, %p1756_p10  ;;  %s1183_s6 = scalar_lea.vmem %s1182_s27, 4096 }
  0x62   : > { %231 = vadd.xlane.f32.xlu0 %v230_v17  ;;  %p1184_p5 = scmp.lt.s32.totalorder %s1686_s10, %s1182_s27  ;;  %p1185_p0 = scmp.lt.s32.totalorder %s1183_s6, %s1177_s30 }
  0x63   : > { %p1180_p4 = pneg %p1179_p2 }
  0x64   : > { %p1186_p6 = por %p1185_p0, %p1184_p5 }
  0x65   : > { %240 = vadd.xlane.f32.xlu1 %v239_v22 }
  0x66   : > { %237 = vadd.xlane.f32.xlu0 %v236_v23  ;;  %p1187_p13 = pnand %p1186_p6, %p1180_p4 }
  0x76   : > { %261 = vbcast.lane.b32.xlu1 %v255_v28, 264 }
  0x7a   : > { %292 = vbcast.lane.b32.xlu1 %v290_v30, 256 }
  0x7c   : > { %257 = vbcast.lane.b32.xlu0 %v255_v28, 256 }
  0x7e   : > { %296 = vbcast.lane.b32.xlu1 %v290_v30, 264 }
  0x80   : > { %265 = vbcast.lane.b32.xlu0 %v255_v28, 272 }
  0x82   : > { %300 = vbcast.lane.b32.xlu1 %v290_v30, 272 }
  0x84   : > { %327 = vbcast.lane.b32.xlu0 %v325_v33, 256 }
  0x86   : > { %331 = vbcast.lane.b32.xlu1 %v325_v33, 264 }
  0x88   : > { %269 = vbcast.lane.b32.xlu0 %v255_v28, 280 }
  0x8a   : > { %304 = vbcast.lane.b32.xlu1 %v290_v30, 280 }
  0x8c   : > { %335 = vbcast.lane.b32.xlu0 %v325_v33, 272 }
  0x8e   : > { %362 = vbcast.lane.b32.xlu1 %v360_v35, 256 }
  0x90   : > { %366 = vbcast.lane.b32.xlu0 %v360_v35, 264 }
  0x92   : > { %273 = vbcast.lane.b32.xlu1 %v255_v28, 288 }
  0x94   : > { %308 = vbcast.lane.b32.xlu0 %v290_v30, 288 }
  0x96   : > { %339 = vbcast.lane.b32.xlu1 %v325_v33, 280 }
  0x98   : > { %370 = vbcast.lane.b32.xlu0 %v360_v35, 272 }
  0x9a   : > { %277 = vbcast.lane.b32.xlu1 %v255_v28, 296 }
  0x9c   : > { %312 = vbcast.lane.b32.xlu0 %v290_v30, 296 }
  0x9e   : > { %343 = vbcast.lane.b32.xlu1 %v325_v33, 288 }
  0xa0   : > { %374 = vbcast.lane.b32.xlu0 %v360_v35, 280 }
  0xa2   : > { %281 = vbcast.lane.b32.xlu1 %v255_v28, 304 }
  0xa4   : > { %316 = vbcast.lane.b32.xlu0 %v290_v30, 304 }
  0xa6   : > { %347 = vbcast.lane.b32.xlu1 %v325_v33, 296 }
  0xa8   : > { %378 = vbcast.lane.b32.xlu0 %v360_v35, 288 }
  0xaa   : > { %285 = vbcast.lane.b32.xlu1 %v255_v28, 312 }
  0xac   : > { %320 = vbcast.lane.b32.xlu0 %v290_v30, 312 }
  0xae   : > { %351 = vbcast.lane.b32.xlu1 %v325_v33, 304 }
  0xb0   : > { %382 = vbcast.lane.b32.xlu0 %v360_v35, 296 }
  0xb2   : > { %355 = vbcast.lane.b32.xlu1 %v325_v33, 312 }
  0xb4   : > { %386 = vbcast.lane.b32.xlu0 %v360_v35, 304 }
  0xb6   : > { %390 = vbcast.lane.b32.xlu1 %v360_v35, 312 }
  0xe6   : > { %v226_v36 = vpop.xlane.xlu1 %225 }
  0xe7   : > { %v220_v37 = vpop.xlane.xlu0 %219  ;;  %v244_v53 = vmul.f32 0.00390625, %v226_v36 }
  0xe8   : > { %v242_v45 = vmul.f32 0.00390625, %v220_v37 }
  0xea   : > { %v229_v38 = vpop.xlane.xlu1 %228 }
  0xeb   : > { %v223_v39 = vpop.xlane.xlu0 %222  ;;  %v245_v62 = vmul.f32 0.00390625, %v229_v38 }
  0xec   : > { %v243_v44 = vmul.f32 0.00390625, %v223_v39 }
  0xee   : > { %v235_v40 = vpop.xlane.xlu1 %234 }
  0xef   : > { %v232_v41 = vpop.xlane.xlu0 %231  ;;  %v247_v39 = vmul.f32 0.00390625, %v235_v40 }
  0xf0   : > { %v246_v30 = vmul.f32 0.00390625, %v232_v41 }
  0xf2   : > { %v1486_v42 = vpop.xlane.xlu1 %240 }
  0xf3   : > { %v1488_v43 = vpop.xlane.xlu0 %237 }
  0xf6   : > { %v262_v46 = vpop.permute.xlu1 %261 }
  0xf7   : > { %v425_v47 = vmul.f32 %v262_v46, %v243_v44  ;;  %v258_v48 = vpop.permute.xlu0 %257 }
  0xf8   : > { %v424_v49 = vmul.f32 %v258_v48, %v242_v45 }
  0xf9   : > { %492 = vperm.xlu1 %1114, %v425_v47  }
  0xfa   : > { %489 = vperm.xlu0 %1113, %v424_v49   ;;  %v293_v50 = vpop.permute.xlu1 %292 }
  0xfb   : > { %v432_v51 = vmul.f32 %v293_v50, %v242_v45  ;;  %v266_v52 = vpop.permute.xlu0 %265 }
  0xfc   : > { %v426_v55 = vmul.f32 %v266_v52, %v244_v53 }
  0xfd   : > { %513 = vperm.xlu1 %1114, %v432_v51   ;;  %v248_v51 = vmul.f32 0.00390625, %v1488_v43 }
  0xfe   : > { %v297_v54 = vpop.permute.xlu1 %296 }
  0xff   : > { %v433_v56 = vmul.f32 %v297_v54, %v243_v44  ;;  %v328_v57 = vpop.permute.xlu0 %327 }
 0x100   : > { %v440_v59 = vmul.f32 %v328_v57, %v242_v45 }
 0x101   : > { %516 = vperm.xlu0 %1113, %v433_v56   ;;  %495 = vperm.xlu1 %1114, %v426_v55  }
 0x102   : > { %v301_v58 = vpop.permute.xlu1 %300 }
 0x103   : > { %v434_v60 = vmul.f32 %v301_v58, %v244_v53  ;;  %v270_v61 = vpop.permute.xlu0 %269 }
 0x104   : > { %v427_v3 = vmul.f32 %v270_v61, %v245_v62 }
 0x105   : > { %519 = vperm.xlu0 %1113, %v434_v60   ;;  %537 = vperm.xlu1 %1114, %v440_v59   ;;  %v249_v59 = vmul.f32 0.00390625, %v1486_v42 }
 0x106   : > { %v332_v63 = vpop.permute.xlu1 %331 }
 0x107   : > { %v441_v7 = vmul.f32 %v332_v63, %v243_v44  ;;  %v336_v10 = vpop.permute.xlu0 %335 }
 0x108   : > { %v442_v16 = vmul.f32 %v336_v10, %v244_v53 }
 0x109   : > { %540 = vperm.xlu0 %1113, %v441_v7   ;;  %498 = vperm.xlu1 %1114, %v427_v3  }
 0x10a   : > { %v305_v11 = vpop.permute.xlu1 %304 }
 0x10b   : > { %v435_v17 = vmul.f32 %v305_v11, %v245_v62  ;;  %v367_v22 = vpop.permute.xlu0 %366 }
 0x10c   : > { %v449_v27 = vmul.f32 %v367_v22, %v243_v44 }
 0x10d   : > { %522 = vperm.xlu0 %1113, %v435_v17   ;;  %543 = vperm.xlu1 %1114, %v442_v16  }
 0x10e   : > { %v363_v23 = vpop.permute.xlu1 %362 }
 0x10f   : > { %v448_v28 = vmul.f32 %v363_v23, %v242_v45  ;;  %v309_v29 = vpop.permute.xlu0 %308 }
 0x110   : > { %v436_v32 = vmul.f32 %v309_v29, %v246_v30 }
 0x111   : > { %561 = vperm.xlu0 %1113, %v448_v28   ;;  %564 = vperm.xlu1 %1114, %v449_v27  }
 0x112   : > { %v274_v31 = vpop.permute.xlu1 %273 }
 0x113   : > { %v428_v33 = vmul.f32 %v274_v31, %v246_v30  ;;  %v371_v34 = vpop.permute.xlu0 %370 }
 0x114   : > { %v450_v36 = vmul.f32 %v371_v34, %v244_v53 }
 0x115   : > { %501 = vperm.xlu0 %1113, %v428_v33   ;;  %525 = vperm.xlu1 %1114, %v436_v32  }
 0x116   : > { %v340_v35 = vpop.permute.xlu1 %339 }
 0x117   : > { %v443_v37 = vmul.f32 %v340_v35, %v245_v62  ;;  %v313_v38 = vpop.permute.xlu0 %312 }
 0x118   : > { %v437_v44 = vmul.f32 %v313_v38, %v247_v39 }
 0x119   : > { %546 = vperm.xlu0 %1113, %v443_v37   ;;  %567 = vperm.xlu1 %1114, %v450_v36  }
 0x11a   : > { %v278_v46 = vpop.permute.xlu1 %277 }
 0x11b   : > { %v429_v45 = vmul.f32 %v278_v46, %v247_v39  ;;  %v375_v47 = vpop.permute.xlu0 %374 }
 0x11c   : > { %v451_v48 = vmul.f32 %v375_v47, %v245_v62 }
 0x11d   : > { %504 = vperm.xlu0 %1113, %v429_v45   ;;  %528 = vperm.xlu1 %1114, %v437_v44  }
 0x11e   : > { %v344_v41 = vpop.permute.xlu1 %343 }
 0x11f   : > { %v444_v49 = vmul.f32 %v344_v41, %v246_v30  ;;  %v317_v50 = vpop.permute.xlu0 %316 }
 0x120   : > { %v438_v53 = vmul.f32 %v317_v50, %v248_v51 }
 0x121   : > { %549 = vperm.xlu0 %1113, %v444_v49   ;;  %570 = vperm.xlu1 %1114, %v451_v48   ;;  %v585_v48 = vand.u32 127, %v252_v24 }
 0x122   : > { %v282_v52 = vpop.permute.xlu1 %281 }
 0x123   : > { %v430_v54 = vmul.f32 %v282_v52, %v248_v51  ;;  %v379_v40 = vpop.permute.xlu0 %378  ;;  %v597_v52 = vadd.s32 4294967280, %v585_v48  ;;  %v618_v24 = vadd.s32 4294967256, %v585_v48 }
 0x124   : > { %v452_v56 = vmul.f32 %v379_v40, %v246_v30 }
 0x125   : > { %507 = vperm.xlu0 %1113, %v430_v54   ;;  %531 = vperm.xlu1 %1114, %v438_v53   ;;  %v604_v53 = vadd.s32 4294967272, %v585_v48 }
 0x126   : > { %v348_v55 = vpop.permute.xlu1 %347 }
 0x127   : > { %v445_v57 = vmul.f32 %v348_v55, %v247_v39  ;;  %v321_v58 = vpop.permute.xlu0 %320 }
 0x128   : > { %v439_v61 = vmul.f32 %v321_v58, %v249_v59  ;;  %v1540_v58 = vsub.s32 %v597_v52, %v1478_v25 }
 0x129   : > { %552 = vperm.xlu0 %1113, %v445_v57   ;;  %573 = vperm.xlu1 %1114, %v452_v56   ;;  %v1537_v56 = vsub.s32 %v585_v48, %v1478_v25  ;;  %v611_v57 = vadd.s32 4294967264, %v585_v48 }
 0x12a   : > { %v286_v60 = vpop.permute.xlu1 %285 }
 0x12b   : > { %v431_v62 = vmul.f32 %v286_v60, %v249_v59  ;;  %v383_v43 = vpop.permute.xlu0 %382  ;;  %v625_v60 = vadd.s32 4294967248, %v585_v48 }
 0x12c   : > { %v453_v3 = vmul.f32 %v383_v43, %v247_v39  ;;  %v632_v43 = vadd.s32 4294967240, %v585_v48 }
 0x12d   : > { %510 = vperm.xlu0 %1113, %v431_v62   ;;  %534 = vperm.xlu1 %1114, %v439_v61  }
 0x12e   : > { %v352_v63 = vpop.permute.xlu1 %351 }
 0x12f   : > { %v446_v7 = vmul.f32 %v352_v63, %v248_v51  ;;  %v387_v10 = vpop.permute.xlu0 %386 }
 0x130   : > { %v454_v16 = vmul.f32 %v387_v10, %v248_v51  ;;  %v590_v51 = vadd.s32 4294967288, %v585_v48 }
 0x131   : > { %555 = vperm.xlu0 %1113, %v446_v7   ;;  %576 = vperm.xlu1 %1114, %v453_v3   ;;  %v1552_v7 = vsub.s32 %v611_v57, %v1478_v25 }
 0x132   : > { %v356_v11 = vpop.permute.xlu1 %355  ;;  %v593_v55 = vsub.s32 %v590_v51, %v1478_v25 }
 0x133   : > { %v447_v17 = vmul.f32 %v356_v11, %v249_v59 }
 0x135   : > { %558 = vperm.xlu0 %1113, %v447_v17   ;;  %579 = vperm.xlu1 %1114, %v454_v16   ;;  %v1558_v17 = vsub.s32 %v618_v24, %v1478_v25 }
 0x136   : > { %v391_v42 = vpop.permute.xlu1 %390 }
 0x137   : > { %v455_v22 = vmul.f32 %v391_v42, %v249_v59  ;;  %v1543_v59 = vsub.s32 %v604_v53, %v1478_v25 }
 0x139   : > { %582 = vperm.xlu0 %1113, %v455_v22  }
 0x178   : > { %v1492_v23 = vpop.permute.xlu1 %492 }
 0x179   : > { %v490_v27 = vpop.permute.xlu0 %489  ;;  %v594_v63 = vrot.slane %v1492_v23, %v593_v55 }
 0x17a   : > { %v589_v3 = vrot.slane %v490_v27, %v1537_v56  ;;  %v1567_v27 = vsub.s32 %v625_v60, %v1478_v25 }
 0x17c   : > { %v1494_v28 = vpop.permute.xlu1 %513 }
 0x180   : > { %v1496_v29 = vpop.permute.xlu1 %495  ;;  %v1498_v30 = vpop.permute.xlu0 %516 }
 0x181   : > { %v601_v10 = vrot.slane %v1496_v29, %v1540_v58  ;;  %v646_v11 = vrot.slane %v1498_v30, %v593_v55  ;;  %v642_v29 = vrot.slane %v1494_v28, %v1537_v56 }
 0x184   : > { %v1500_v31 = vpop.permute.xlu1 %537  ;;  %v1502_v32 = vpop.permute.xlu0 %519 }
 0x185   : > { %v651_v42 = vrot.slane %v1502_v32, %v1540_v58  ;;  %v681_v30 = vrot.slane %v1500_v31, %v1537_v56  ;;  %v1576_v32 = vsub.s32 %v632_v43, %v1478_v25 }
 0x188   : > { %v1504_v33 = vpop.permute.xlu1 %498  ;;  %v541_v34 = vpop.permute.xlu0 %540 }
 0x189   : > { %v685_v16 = vrot.slane %v541_v34, %v593_v55  ;;  %v608_v22 = vrot.slane %v1504_v33, %v1543_v59 }
 0x18b   : > { %v686_v53 = vsel %vm595_vm0, %v685_v16, %v681_v30 }
 0x18c   : > { %v1506_v35 = vpop.permute.xlu1 %543  ;;  %v1508_v36 = vpop.permute.xlu0 %522 }
 0x18d   : > { %v690_v23 = vrot.slane %v1506_v35, %v1540_v58  ;;  %v656_v34 = vrot.slane %v1508_v36, %v1543_v59  ;;  %v596_v35 = vsel %vm595_vm0, %v594_v63, %v589_v3  ;;  %v647_v36 = vsel %vm595_vm0, %v646_v11, %v642_v29 }
 0x18e   : > { %v603_v31 = vsel %vm602_vm1, %v601_v10, %v596_v35  ;;  %v652_v24 = vsel %vm602_vm1, %v651_v42, %v647_v36 }
 0x18f   : > { %v610_v60 = vsel %vm609_vm2, %v608_v22, %v603_v31 }
 0x190   : > { %v1510_v37 = vpop.permute.xlu1 %564  ;;  %v1512_v38 = vpop.permute.xlu0 %561 }
 0x191   : > { %v724_v51 = vrot.slane %v1510_v37, %v593_v55  ;;  %v720_v52 = vrot.slane %v1512_v38, %v1537_v56  ;;  %v691_v37 = vsel %vm602_vm1, %v690_v23, %v686_v53  ;;  %v657_v38 = vsel %vm609_vm2, %v656_v34, %v652_v24 }
 0x193   : > { %v725_v3 = vsel %vm595_vm0, %v724_v51, %v720_v52 }
 0x194   : > { %v1514_v39 = vpop.permute.xlu1 %525  ;;  %v1516_v46 = vpop.permute.xlu0 %501 }
 0x195   : > { %v661_v28 = vrot.slane %v1514_v39, %v1552_v7  ;;  %v615_v57 = vrot.slane %v1516_v46, %v1552_v7 }
 0x197   : > { %v662_v10 = vsel %vm616_vm3, %v661_v28, %v657_v38 }
 0x198   : > { %v1518_v44 = vpop.permute.xlu1 %567  ;;  %v1520_v45 = vpop.permute.xlu0 %546 }
 0x199   : > { %v729_v39 = vrot.slane %v1518_v44, %v1540_v58  ;;  %v695_v55 = vrot.slane %v1520_v45, %v1543_v59  ;;  %v617_v44 = vsel %vm616_vm3, %v615_v57, %v610_v60 }
 0x19b   : > { %v730_v23 = vsel %vm602_vm1, %v729_v39, %v725_v3  ;;  %v696_v29 = vsel %vm609_vm2, %v695_v55, %v691_v37 }
 0x19c   : > { %v1522_v47 = vpop.permute.xlu1 %528  ;;  %v1524_v41 = vpop.permute.xlu0 %504 }
 0x19d   : > { %v666_v43 = vrot.slane %v1522_v47, %v1558_v17  ;;  %v622_v11 = vrot.slane %v1524_v41, %v1558_v17 }
 0x19f   : > { %v624_v34 = vsel %vm623_vm4, %v622_v11, %v617_v44 }
 0x1a0   : > { %v1527_v49 = vpop.permute.xlu1 %570  ;;  %v1529_v50 = vpop.permute.xlu0 %549 }
 0x1a1   : > { %v700_v16 = vrot.slane %v1529_v50, %v1552_v7  ;;  %v734_v42 = vrot.slane %v1527_v49, %v1543_v59 }
 0x1a3   : > { %v701_v49 = vsel %vm616_vm3, %v700_v16, %v696_v29 }
 0x1a4   : > { %v1531_v54 = vpop.permute.xlu1 %531  ;;  %v1533_v40 = vpop.permute.xlu0 %507 }
 0x1a5   : > { %v671_v45 = vrot.slane %v1531_v54, %v1567_v27  ;;  %v629_v47 = vrot.slane %v1533_v40, %v1567_v27  ;;  %v667_v54 = vsel %vm623_vm4, %v666_v43, %v662_v10  ;;  %v768_v43 = vld [vmem:[%s1736_s2] sm:$0xf] }
 0x1a7   : > { %v631_v35 = vsel %vm630_vm5, %v629_v47, %v624_v34 }
 0x1a8   : > { %v1545_v61 = vpop.permute.xlu1 %573  ;;  %v1547_v62 = vpop.permute.xlu0 %552 }
 0x1a9   : > { %v705_v58 = vrot.slane %v1547_v62, %v1558_v17  ;;  %v739_v40 = vrot.slane %v1545_v61, %v1552_v7  ;;  %v735_v61 = vsel %vm609_vm2, %v734_v42, %v730_v23 }
 0x1ab   : > { %v706_v51 = vsel %vm623_vm4, %v705_v58, %v701_v49 }
 0x1ac   : > { %v535_v33 = vpop.permute.xlu1 %534  ;;  %v511_v48 = vpop.permute.xlu0 %510 }
 0x1ad   : > { %v676_v22 = vrot.slane %v535_v33, %v1576_v32  ;;  %v636_v41 = vrot.slane %v511_v48, %v1576_v32  ;;  %v672_v48 = vsel %vm630_vm5, %v671_v45, %v667_v54 }
 0x1af   : > { %v677_v7 = vsel %vm637_vm6, %v676_v22, %v672_v48  ;;  %v638_v28 = vsel %vm637_vm6, %v636_v41, %v631_v35 }
 0x1b0   : > { %v577_v63 = vpop.permute.xlu1 %576  ;;  %v556_v46 = vpop.permute.xlu0 %555  ;;  %v757_v60 = vsel %vm756_vm7, %v677_v7, %v638_v28 }
 0x1b1   : > { %v710_v50 = vrot.slane %v556_v46, %v1567_v27  ;;  %v744_v59 = vrot.slane %v577_v63, %v1558_v17  ;;  %v740_v17 = vsel %vm616_vm3, %v739_v40, %v735_v61  ;;  %v1254_v63 = vmov 0.0  }
 0x1b2   : > { %1044 = vmatprep.subr.mxu0 %v1254_v63  ;;  %1046 = vmatprep.mubr.msk.f32.mxu0 %vm1255_vm12, %v1254_v63 }
 0x1b3   : > { %v711_v31 = vsel %vm630_vm5, %v710_v50, %v706_v51  ;;  %v745_v57 = vsel %vm623_vm4, %v744_v59, %v740_v17  ;;  %1045 = vmatpush3.msk.msra.mxu0 %vm777_vm11, %v768_v43 }
 0x1b4   : > { %v580_v30 = vpop.permute.xlu1 %579  ;;  %v559_v62 = vpop.permute.xlu0 %558 }
 0x1b5   : > { %v715_v33 = vrot.slane %v559_v62, %v1576_v32  ;;  %v749_v52 = vrot.slane %v580_v30, %v1567_v27 }
 0x1b7   : > { %v716_v36 = vsel %vm637_vm6, %v715_v33, %v711_v31  ;;  %v750_v27 = vsel %vm630_vm5, %v749_v52, %v745_v57 }
 0x1b8   : > { %v583_v53 = vpop.permute.xlu0 %582  ;;  %v759_v38 = vsel %vm758_vm8, %v716_v36, %v757_v60 }
 0x1b9   : > { %v754_v24 = vrot.slane %v583_v53, %v1576_v32 }
 0x1bb   : > { %v755_v37 = vsel %vm637_vm6, %v754_v24, %v750_v27 }
 0x1bc   : > { %v761_v39 = vsel %vm760_vm9, %v755_v37, %v759_v38 }
 0x1bd   : > { %v764_v55 = vsel %vm763_vm10, %v761_v39, 0.0 }
 0x1be   : > { %765 = vadd.xlane.f32.xlu1 %v764_v55 }
 0x24b   : > { %v766_v32 = vpop.xlane.xlu1 %765 }
 0x24c   : > { %v767_v46 = vmax.f32 %v766_v32, 0.0 }
 0x24e   : > { %v773_v3 = vrot.slane %v767_v46, %v1537_v56 }
 0x250   : > { %1047 = vmatmul.mubr.msk.f32.vlgmr.msra.gmra.mrb[0].mxu0 %vm774_vm13, %v773_v3 }
 0x323   : > { %v847_v10 = vpop.f32.mrb[0].mxu0 }
 0x324   : > { %v1034_v11 = vmul.f32 -1.442695, %v847_v10  ;;  %v1048_v16 = vpop.f32.mrb[1].mxu0 }
 0x326   : > { %1115 = vpow2.f32 %v1034_v11 }
 0x330   : > { %v1116_v44 = vpop.eup %1115 }
 0x331   : > { %v854_v45 = vadd.f32 1.0, %v1116_v44 }
 0x333   : > { %1117 = vrcp.f32 %v854_v45 }
 0x33d   : > { %v1118_v47 = vpop.eup %1117 }
 0x33e   : > { %v860_v58 = vrot.slane %v1118_v47, %v254_v26 }
 0x340   : > { %862 = vbcast.lane.b32.xlu0 %v860_v58, 256 }
 0x344   : > { %866 = vbcast.lane.b32.xlu0 %v860_v58, 264 }
 0x348   : > { %870 = vbcast.lane.b32.xlu0 %v860_v58, 272 }
 0x34c   : > { %874 = vbcast.lane.b32.xlu0 %v860_v58, 280 }
 0x350   : > { %878 = vbcast.lane.b32.xlu0 %v860_v58, 288 }
 0x354   : > { %882 = vbcast.lane.b32.xlu0 %v860_v58, 296 }
 0x358   : > { %886 = vbcast.lane.b32.xlu0 %v860_v58, 304 }
 0x35c   : > { %890 = vbcast.lane.b32.xlu0 %v860_v58, 312 }
 0x3b2   : > { %v863_v56 = vpop.permute.xlu0 %862 }
 0x3b3   : > { %v892_v42 = vmul.f32 %v863_v56, %v1433_v2  ;;  %v893_v22 = vmul.f32 %v863_v56, %v1437_v4 }
 0x3b5   : > { %908 = vst [vmem:[%s1651_s4] sm:$0xff] %v892_v42  ;;  %909 = vst [vmem:[%s1651_s4 + $0x8] sm:$0xff] %v893_v22 }
 0x3b6   : > { %v867_v25 = vpop.permute.xlu0 %866 }
 0x3b7   : > { %v894_v26 = vmul.f32 %v867_v25, %v1445_v8  ;;  %v895_v2 = vmul.f32 %v867_v25, %v1447_v9 }
 0x3b9   : > { %910 = vst [vmem:[%s1651_s4 + $0x10] sm:$0xff] %v894_v26  ;;  %911 = vst [vmem:[%s1651_s4 + $0x18] sm:$0xff] %v895_v2 }
 0x3ba   : > { %v871_v4 = vpop.permute.xlu0 %870 }
 0x3bb   : > { %v896_v41 = vmul.f32 %v871_v4, %v1429_v0  ;;  %v897_v50 = vmul.f32 %v871_v4, %v1431_v1 }
 0x3bd   : > { %912 = vst [vmem:[%s1651_s4 + $0x20] sm:$0xff] %v896_v41  ;;  %913 = vst [vmem:[%s1651_s4 + $0x28] sm:$0xff] %v897_v50 }
 0x3be   : > { %v875_v23 = vpop.permute.xlu0 %874 }
 0x3bf   : > { %v898_v29 = vmul.f32 %v875_v23, %v1439_v5  ;;  %v899_v8 = vmul.f32 %v875_v23, %v1441_v6 }
 0x3c1   : > { %914 = vst [vmem:[%s1651_s4 + $0x30] sm:$0xff] %v898_v29  ;;  %915 = vst [vmem:[%s1651_s4 + $0x38] sm:$0xff] %v899_v8 }
 0x3c2   : > { %v879_v9 = vpop.permute.xlu0 %878 }
 0x3c3   : > { %v900_v0 = vmul.f32 %v879_v9, %v1457_v14  ;;  %v901_v1 = vmul.f32 %v879_v9, %v1459_v15 }
 0x3c5   : > { %916 = vst [vmem:[%s1651_s4 + $0x40] sm:$0xff] %v900_v0  ;;  %917 = vst [vmem:[%s1651_s4 + $0x48] sm:$0xff] %v901_v1 }
 0x3c6   : > { %v883_v54 = vpop.permute.xlu0 %882 }
 0x3c7   : > { %v902_v40 = vmul.f32 %v883_v54, %v1453_v12  ;;  %v903_v5 = vmul.f32 %v883_v54, %v1455_v13 }
 0x3c9   : > { %918 = vst [vmem:[%s1651_s4 + $0x50] sm:$0xff] %v902_v40  ;;  %919 = vst [vmem:[%s1651_s4 + $0x58] sm:$0xff] %v903_v5 }
 0x3ca   : > { %v887_v6 = vpop.permute.xlu0 %886 }
 0x3cb   : > { %v904_v30 = vmul.f32 %v887_v6, %v1469_v20  ;;  %v905_v14 = vmul.f32 %v887_v6, %v1471_v21 }
 0x3cd   : > { %920 = vst [vmem:[%s1651_s4 + $0x60] sm:$0xff] %v904_v30  ;;  %921 = vst [vmem:[%s1651_s4 + $0x68] sm:$0xff] %v905_v14 }
 0x3ce   : > { %v891_v15 = vpop.permute.xlu0 %890 }
 0x3cf   : > { %v906_v12 = vmul.f32 %v891_v15, %v1465_v18  ;;  %v907_v13 = vmul.f32 %v891_v15, %v1467_v19 }
 0x3d1   : > { %922 = vst [vmem:[%s1651_s4 + $0x70] sm:$0xff] %v906_v12  ;;  %923 = vst [vmem:[%s1651_s4 + $0x78] sm:$0xff] %v907_v13 }
 0x3d2   : > { %1190 = shalt.err (!%p1187_p13)
}
 0x3d3   : > { %s1191_s8 = scalar_lea.hbm %s1684_s20, 2048  ;;  %s1195_s5 = scalar_lea.hbm %s1737_s3, 4096 }
 0x3d4   : > { %p1192_p7 = scmp.ne.s32.totalorder %s1684_s20, %s1191_s8  ;;  %p1196_p1 = scmp.lt.u32.totalorder %s1684_s20, %s1737_s3 }
 0x3d5   : > { %p1197_p11 = scmp.lt.u32.totalorder %s1195_s5, %s1191_s8  ;;  %p1199_p9 = scmp.lt.u32.totalorder %s1191_s8, %s1684_s20 }
 0x3d6   : > { %p1193_p3 = pnand %p1192_p7, %p1756_p10 }
 0x3d7   : > { %p1198_p8 = por %p1197_p11, %p1196_p1 }
 0x3d8   : > { %p1194_p12 = pneg %p1193_p3 }
 0x3d9   : > { %p1200_p2 = por %p1199_p9, %p1198_p8 }
 0x3db   : > { %p1201_p4 = pnand %p1200_p2, %p1194_p12 }
 0x3dd   : > { %1204 = shalt.err (!%p1201_p4)
}
 0x3de   : > { %s1257_s26 = smov 256   ;;  %s1258_s4 = smov 16  }
 0x3df   : > { %1055 = dma.vmem_to_hbm [thread:$0]  (%p1756_p10), %s1686_s10, 2048, %s1684_s20, %s925_s16, %s1257_s26, %s1257_s26, %s1258_s4  }
 0x3e0 PF: > { %s953_s7 = sand.u32 1, %s1235_s12   ;;  %p1757_p5 = scmp.ne.s32.totalorder %s1746_s25, 0 }
 0x3e1   : > { %p1758_p0 = scmp.ge.s32.totalorder %s1247_s15, 2  ;;  %s954_s29 = scalar_lea.sflag [#allocation4], %s953_s7 }
 0x3e3   : > { %p1066_p6 = pnand %p1758_p0, %p1757_p5 }
 0x3e5   : > { %1230 = dma.done.wait (!%p1066_p6), %s954_s29, 2048  }
 0x3e6   : > { %1232 = vsyncadd (!%p1066_p6), %s954_s29, 4294965248  ;;  %p17_p13 = scmp.ge.s32.totalorder %s1304_s18, 4   ;;  %s1759_s12 = smov %s1239_s13 }
 0x3e7   : > { %s1760_s13 = smov %s1243_s14  ;;  %s1761_s14 = smov %s1316_s21 }
 0x3e8   : > { %s1762_s15 = smov %s1304_s18  ;;  %19 = sbr.rel (!%p17_p13) target bundleno = 6 (0x6), region = 81 }
 0x3ef   :  { %959 = vsyncpa [#allocation3], 1 }
 0x3f0   :  { %961 = vsyncpa [#allocation3 + $0x1], 1 }
 0x3f1   :  { %962 = vsyncpa [#allocation6], 1 }
 0x3f2   :  { %963 = vsyncpa [#allocation4], 1 }
 0x3f3   :  { %965 = vsyncpa [#allocation4 + $0x1], 1 }

</bundles_post_ra>
